<compile_context>
chip_gen: v7x
topology: tpu7x:2x2x1
jax: 0.10.0
libtpu: 0.0.40
codegen_flags: <defaults>
</compile_context>

<pallas_src>
import jax
import jax.numpy as jnp
import numpy as np
from jax import lax
from jax.experimental import pallas as pl
from jax.experimental.pallas import tpu as pltpu

ALPHA, BETA, GAMMA = 1.0, 1.0, 0.001


def _make_kernel(delta_v, delta_d, K, F):
    dv = float(delta_v)
    dd = float(delta_d)

    def kernel(nobj_ref, pred_ref, gt_ref, out_ref, sums_ref, cnt_ref, hinge_ref):
        b = pl.program_id(0)
        ph = pl.program_id(1)
        t = pl.program_id(2)
        last_t = pl.num_programs(2) - 1

        n = nobj_ref[b]                          # int32 scalar: valid objects this sample
        n_f = n.astype(jnp.float32)

        pred = pred_ref[0]                       # (F, THW) f32
        gt = gt_ref[0]                           # (K, THW) f32

        # ------------- init accumulators once per batch sample -------------
        @pl.when((ph == 0) & (t == 0))
        def _init():
            sums_ref[...] = jnp.zeros_like(sums_ref)
            cnt_ref[...] = jnp.zeros_like(cnt_ref)
            hinge_ref[...] = jnp.zeros_like(hinge_ref)

        # ------------- phase 0: per-instance sums & counts -------------
        @pl.when(ph == 0)
        def _phase0():
            # (K, THW) @ (F, THW)^T -> (K, F)   (counts use a free XLU lane-reduce,
            # no extra MXU op)
            sums_ref[...] += lax.dot_general(
                gt, pred, (((1,), (1,)), ((), ())),
                preferred_element_type=jnp.float32)
            cnt_ref[...] += jnp.sum(gt, axis=1, keepdims=True)          # (K, 1)

        # ------------- phase 1: variance hinge accumulation -------------
        @pl.when(ph == 1)
        def _phase1():
            counts = cnt_ref[...]
            valid_col = lax.broadcasted_iota(jnp.int32, (K, 1), 0) < n
            counts_safe = jnp.where(counts > 0.0, counts, 1.0)
            means = jnp.where(valid_col, sums_ref[...] / counts_safe, 0.0)  # (K, F)

            pred_sq = jnp.sum(pred * pred, axis=0, keepdims=True)           # (1, THW)
            msq = jnp.sum(means * means, axis=1, keepdims=True)             # (K, 1)
            cross = lax.dot_general(means, pred, (((1,), (0,)), ((), ())),
                                    preferred_element_type=jnp.float32)     # (K, THW)
            d2 = jnp.maximum(pred_sq + msq - 2.0 * cross, 0.0)
            h = jnp.maximum(jnp.sqrt(d2) - dv, 0.0)
            # valid-instance masking is applied once at finalize (on the (K,1) acc)
            hinge_ref[...] += jnp.sum(h * h * gt, axis=1, keepdims=True)    # (K, 1)

        # ------------- finalize: var / dist / reg scalars -------------
        @pl.when((ph == 1) & (t == last_t))
        def _finalize():
            counts = cnt_ref[...]
            valid_col = lax.broadcasted_iota(jnp.int32, (K, 1), 0) < n
            validf = valid_col.astype(jnp.float32)
            counts_safe = jnp.where(counts > 0.0, counts, 1.0)
            means = jnp.where(valid_col, sums_ref[...] / counts_safe, 0.0)  # (K, F)

            # ---- variance term ----
            num = jnp.sum(hinge_ref[...] * validf)
            den = jnp.sum(counts * validf)
            var_i = jnp.where(den > 0.0, num / den, 0.0)

            # ---- inter-cluster distance term ----
            gram = lax.dot_general(means, means, (((1,), (1,)), ((), ())),
                                   preferred_element_type=jnp.float32)      # (K, K)
            ri = lax.broadcasted_iota(jnp.int32, (K, K), 0)
            ci = lax.broadcasted_iota(jnp.int32, (K, K), 1)
            diag = jnp.where(ri == ci, gram, 0.0)
            msq_col = jnp.sum(diag, axis=1, keepdims=True)                  # (K, 1)
            msq_row = jnp.sum(diag, axis=0, keepdims=True)                  # (1, K)
            d2p = jnp.maximum(msq_col + msq_row - 2.0 * gram, 0.0)
            dpair = jnp.sqrt(d2p)
            pair_mask = (ri < n) & (ci < n) & (ri != ci)
            hd = jnp.maximum(2.0 * dd - dpair, 0.0)
            dist_sum = jnp.sum(jnp.where(pair_mask, hd * hd, 0.0))
            dist_i = jnp.where(n > 1,
                               dist_sum / jnp.maximum(n_f * (n_f - 1.0), 1.0),
                               0.0)

            # ---- regularization term ----
            norms = jnp.sqrt(msq_col)                                       # (K, 1)
            reg_i = jnp.where(n > 0,
                              jnp.sum(norms * validf) / jnp.maximum(n_f, 1.0),
                              0.0)

            # single lane-dense output block; lanes 0/1/2 carry var/dist/reg
            lane = lax.broadcasted_iota(jnp.int32, out_ref.shape, 2)
            out_ref[...] = jnp.where(lane == 0, var_i,
                            jnp.where(lane == 1, dist_i,
                             jnp.where(lane == 2, reg_i, 0.0)))

    return kernel


def _pick_hw_tile(HW, cap_lanes=8192):
    """Largest multiple of 128 that divides HW (capped); fall back to full HW."""
    if HW % 128 != 0:
        return HW                          # full-extent block is always legal
    t = min(HW, max(128, (cap_lanes // 128) * 128))
    while HW % t != 0:
        t -= 128
    return t


def discriminative_loss_pallas(x, target, n_objects, max_n_objects,
                               delta_v, delta_d, norm=2, hw_tile=None):
    if norm != 2:
        # TODO(synk): only the L2-norm variant of the loss is implemented in the kernel.
        raise NotImplementedError("only norm=2 is supported")

    bs, F, H, W = x.shape
    K = target.shape[1]
    assert K == max_n_objects, "kernel assumes n_instances == max_n_objects"
    HW = H * W

    # Channel-major views: a pure reshape of the NCHW tensors (no HBM transpose pass).
    pred = jnp.asarray(x, jnp.float32).reshape(bs, F, HW)
    gt = jnp.asarray(target).astype(jnp.float32).reshape(bs, K, HW)
    nobj = jnp.asarray(n_objects).reshape(bs).astype(jnp.int32)

    THW = int(hw_tile) if hw_tile is not None else _pick_hw_tile(HW)
    assert HW % THW == 0 and (THW % 128 == 0 or THW == HW), "bad HW tile"
    n_t = HW // THW

    kernel = _make_kernel(delta_v, delta_d, K, F)

    # Size the scoped VMEM limit from the chosen tile (double-buffered inputs + slack).
    tile_bytes = (F + K) * THW * 4
    vmem_limit = int(min(48 * 2**20, max(8 * 2**20, 4 * tile_bytes + 2 * 2**20)))

    grid_spec = pltpu.PrefetchScalarGridSpec(
        num_scalar_prefetch=1,
        grid=(bs, 2, n_t),                     # (batch, phase, HW tile)
        in_specs=[
            pl.BlockSpec((1, F, THW), lambda b, ph, t, nobj_ref: (b, 0, t)),
            pl.BlockSpec((1, K, THW), lambda b, ph, t, nobj_ref: (b, 0, t)),
        ],
        out_specs=pl.BlockSpec((1, 8, 128), lambda b, ph, t, nobj_ref: (b, 0, 0)),
        scratch_shapes=[
            pltpu.VMEM((K, F), jnp.float32),   # per-instance feature sums
            pltpu.VMEM((K, 1), jnp.float32),   # per-instance pixel counts
            pltpu.VMEM((K, 1), jnp.float32),   # per-instance variance hinge sums
        ],
    )

    out = pl.pallas_call(
        kernel,
        out_shape=jax.ShapeDtypeStruct((bs, 8, 128), jnp.float32),
        grid_spec=grid_spec,
        compiler_params=pltpu.CompilerParams(
            dimension_semantics=("parallel", "arbitrary", "arbitrary"),
            vmem_limit_bytes=vmem_limit),
    )(nobj, pred, gt)

    scal = out[:, 0, 0:3]                      # one contiguous read-back: (bs, 3)
    per_sample = ALPHA * scal[:, 0] + BETA * scal[:, 1] + GAMMA * scal[:, 2]
    return jnp.mean(per_sample)


def _reference_loss(x, target, n_objects, delta_v, delta_d):
    """Pure numpy mirror of the PyTorch code (norm=2) for verification."""
    x = np.asarray(x, dtype=np.float32)
    target = np.asarray(target)
    nob = np.asarray(n_objects).reshape(-1).astype(np.int64)
    bs, F, H, W = x.shape
    K = target.shape[1]
    pred = x.transpose(0, 2, 3, 1).reshape(bs, H * W, F)
    gt = target.transpose(0, 2, 3, 1).reshape(bs, H * W, K).astype(np.float32)
    var_t, dist_t, reg_t = 0.0, 0.0, 0.0
    for i in range(bs):
        n = int(nob[i])
        g = gt[i][:, :n]
        p = pred[i]
        counts = g.sum(0)
        mu = (g.T @ p) / counts[:, None]
        # variance
        d = np.linalg.norm(p[:, None, :] - mu[None, :, :], axis=2)
        hv = np.maximum(d - delta_v, 0.0) ** 2 * g
        var_t += hv.sum() / g.sum()
        # distance
        if n > 1:
            dd = np.linalg.norm(mu[:, None, :] - mu[None, :, :], axis=2)
            margin = 2.0 * delta_d * (1.0 - np.eye(n))
            dist_t += (np.maximum(margin - dd, 0.0) ** 2).sum() / (n * (n - 1))
        # regularization
        reg_t += np.mean(np.linalg.norm(mu, axis=1))
    return (ALPHA * var_t + BETA * dist_t + GAMMA * reg_t) / bs


if __name__ == "__main__":
    key = jax.random.PRNGKey(0)
    bs, n_filters, H, W = 2, 8, 32, 32
    max_n_objects = 4
    delta_v, delta_d = 0.5, 1.5

    k1, k2 = jax.random.split(key)
    x = jax.random.normal(k1, (bs, n_filters, H, W), dtype=jnp.float32)

    n_objects = jnp.array([[3], [2]], dtype=jnp.int32)                 # (bs, 1)
    labels = jax.random.randint(k2, (bs, H, W), 0, 1000)
    labels = labels % n_objects.reshape(bs, 1, 1)                      # per-pixel id < n_i
    target = (labels[:, None, :, :] ==
              jnp.arange(max_n_objects)[None, :, None, None]).astype(jnp.int32)  # (bs,K,H,W)

    # hw_tile=256 forces multiple HW tiles so the two-phase streaming path is exercised.
    loss = discriminative_loss_pallas(x, target, n_objects, max_n_objects,
                                      delta_v, delta_d, norm=2, hw_tile=256)
    loss = jax.block_until_ready(loss)

    ref = _reference_loss(x, target, n_objects, delta_v, delta_d)
    assert np.allclose(float(loss), ref, rtol=1e-3, atol=1e-3), (float(loss), ref)
    print("KERNEL_OK")
</pallas_src>

<mosaic_0001>
module attributes {stable_mosaic.version = 11 : i64} {
  func.func @kernel(%arg0: i32, %arg1: i32, %arg2: i32, %arg3: memref<2xi32, #tpu.memory_space<smem>>, %arg4: memref<1x8x256xf32, #tpu.memory_space<vmem>>, %arg5: memref<1x4x256xf32, #tpu.memory_space<vmem>>, %arg6: memref<1x8x128xf32, #tpu.memory_space<vmem>>, %arg7: memref<4x8xf32, #tpu.memory_space<vmem>>, %arg8: memref<4x1xf32, #tpu.memory_space<vmem>>, %arg9: memref<4x1xf32, #tpu.memory_space<vmem>>) attributes {dimension_semantics = [#tpu.dimension_semantics<parallel>, #tpu.dimension_semantics<arbitrary>, #tpu.dimension_semantics<arbitrary>], iteration_bounds = array<i64: 2, 2, 4>, scalar_prefetch = 1 : i64, scratch_operands = 3 : i64, tpu.core_type = #tpu.core_type<tc>, window_params = [{transform_indices = @transform_0, window_bounds = array<i64: 1, 8, 256>}, {transform_indices = @transform_1, window_bounds = array<i64: 1, 4, 256>}, {transform_indices = @transform_2, window_bounds = array<i64: 1, 8, 128>}]} {
    %0 = arith.index_cast %arg0 : i32 to index
    %1 = memref.load %arg3[%0] : memref<2xi32, #tpu.memory_space<smem>>
    %2 = arith.sitofp %1 : i32 to f32
    %c0 = arith.constant 0 : index
    %c0_0 = arith.constant 0 : index
    %c0_1 = arith.constant 0 : index
    %3 = vector.load %arg4[%c0, %c0_0, %c0_1] : memref<1x8x256xf32, #tpu.memory_space<vmem>>, vector<1x8x256xf32>
    %4 = vector.shape_cast %3 : vector<1x8x256xf32> to vector<8x256xf32>
    %c0_2 = arith.constant 0 : index
    %c0_3 = arith.constant 0 : index
    %c0_4 = arith.constant 0 : index
    %5 = vector.load %arg5[%c0_2, %c0_3, %c0_4] : memref<1x4x256xf32, #tpu.memory_space<vmem>>, vector<1x4x256xf32>
    %6 = vector.shape_cast %5 : vector<1x4x256xf32> to vector<4x256xf32>
    %c0_i32 = arith.constant 0 : i32
    %7 = arith.cmpi eq, %arg1, %c0_i32 : i32
    %c0_i32_5 = arith.constant 0 : i32
    %8 = arith.cmpi eq, %arg2, %c0_i32_5 : i32
    %9 = arith.andi %7, %8 : i1
    %10 = arith.extui %9 : i1 to i32
    %c0_i32_6 = arith.constant 0 : i32
    %11 = arith.cmpi ne, %10, %c0_i32_6 : i32
    scf.if %11 {
      %cst = arith.constant 0.000000e+00 : f32
      %23 = vector.broadcast %cst : f32 to vector<4x8xf32>
      %c0_12 = arith.constant 0 : index
      %c0_13 = arith.constant 0 : index
      %24 = vector.load %arg7[%c0_12, %c0_13] : memref<4x8xf32, #tpu.memory_space<vmem>>, vector<4x8xf32>
      tpu.vector_store %arg7[%c0_12, %c0_13], %23 {strides = array<i32>} : memref<4x8xf32, #tpu.memory_space<vmem>>, vector<4x8xf32>,
      %cst_14 = arith.constant 0.000000e+00 : f32
      %25 = vector.broadcast %cst_14 : f32 to vector<4x1xf32>
      %c0_15 = arith.constant 0 : index
      %c0_16 = arith.constant 0 : index
      %26 = vector.load %arg8[%c0_15, %c0_16] : memref<4x1xf32, #tpu.memory_space<vmem>>, vector<4x1xf32>
      tpu.vector_store %arg8[%c0_15, %c0_16], %25 {strides = array<i32>} : memref<4x1xf32, #tpu.memory_space<vmem>>, vector<4x1xf32>,
      %cst_17 = arith.constant 0.000000e+00 : f32
      %27 = vector.broadcast %cst_17 : f32 to vector<4x1xf32>
      %c0_18 = arith.constant 0 : index
      %c0_19 = arith.constant 0 : index
      %28 = vector.load %arg9[%c0_18, %c0_19] : memref<4x1xf32, #tpu.memory_space<vmem>>, vector<4x1xf32>
      tpu.vector_store %arg9[%c0_18, %c0_19], %27 {strides = array<i32>} : memref<4x1xf32, #tpu.memory_space<vmem>>, vector<4x1xf32>,
    } else {
    }
    %c0_i32_7 = arith.constant 0 : i32
    %12 = arith.cmpi eq, %arg1, %c0_i32_7 : i32
    %13 = arith.extui %12 : i1 to i32
    %c0_i32_8 = arith.constant 0 : i32
    %14 = arith.cmpi ne, %13, %c0_i32_8 : i32
    scf.if %14 {
      %c0_12 = arith.constant 0 : index
      %c0_13 = arith.constant 0 : index
      %23 = vector.load %arg7[%c0_12, %c0_13] : memref<4x8xf32, #tpu.memory_space<vmem>>, vector<4x8xf32>
      %cst = arith.constant dense<0.000000e+00> : vector<4x8xf32>
      %24 = tpu.matmul %6, %4, %cst {dimension_numbers = #tpu.dot_dimension_numbers<[1], [1], [0], [0], [0, 0, 1, 0], [], []>} : vector<4x256xf32>, vector<8x256xf32>, vector<4x8xf32> -> vector<4x8xf32>
      %25 = arith.addf %23, %24 : vector<4x8xf32>
      %c0_14 = arith.constant 0 : index
      %c0_15 = arith.constant 0 : index
      %26 = vector.load %arg7[%c0_14, %c0_15] : memref<4x8xf32, #tpu.memory_space<vmem>>, vector<4x8xf32>
      tpu.vector_store %arg7[%c0_14, %c0_15], %25 {strides = array<i32>} : memref<4x8xf32, #tpu.memory_space<vmem>>, vector<4x8xf32>,
      %c0_16 = arith.constant 0 : index
      %c0_17 = arith.constant 0 : index
      %27 = vector.load %arg8[%c0_16, %c0_17] : memref<4x1xf32, #tpu.memory_space<vmem>>, vector<4x1xf32>
      %cst_18 = arith.constant dense<0.000000e+00> : vector<4xf32>
      %28 = vector.multi_reduction <add>, %6, %cst_18 [1] : vector<4x256xf32> to vector<4xf32>
      %29 = vector.shape_cast %28 : vector<4xf32> to vector<4x1xf32>
      %30 = arith.addf %27, %29 : vector<4x1xf32>
      %c0_19 = arith.constant 0 : index
      %c0_20 = arith.constant 0 : index
      %31 = vector.load %arg8[%c0_19, %c0_20] : memref<4x1xf32, #tpu.memory_space<vmem>>, vector<4x1xf32>
      tpu.vector_store %arg8[%c0_19, %c0_20], %30 {strides = array<i32>} : memref<4x1xf32, #tpu.memory_space<vmem>>, vector<4x1xf32>,
    } else {
    }
    %c1_i32 = arith.constant 1 : i32
    %15 = arith.cmpi eq, %arg1, %c1_i32 : i32
    %16 = arith.extui %15 : i1 to i32
    %c0_i32_9 = arith.constant 0 : i32
    %17 = arith.cmpi ne, %16, %c0_i32_9 : i32
    scf.if %17 {
      %c0_12 = arith.constant 0 : index
      %c0_13 = arith.constant 0 : index
      %23 = vector.load %arg8[%c0_12, %c0_13] : memref<4x1xf32, #tpu.memory_space<vmem>>, vector<4x1xf32>
      %24 = tpu.iota {dimensions = array<i32: 0>} : vector<4x1xi32>
      %25 = vector.broadcast %1 : i32 to vector<4x1xi32>
      %26 = arith.cmpi slt, %24, %25 : vector<4x1xi32>
      %cst = arith.constant 0.000000e+00 : f32
      %27 = vector.broadcast %cst : f32 to vector<4x1xf32>
      %28 = arith.cmpf ogt, %23, %27 : vector<4x1xf32>
      %cst_14 = arith.constant 1.000000e+00 : f32
      %29 = vector.broadcast %cst_14 : f32 to vector<4x1xf32>
      %30 = arith.select %28, %23, %29 : vector<4x1xi1>, vector<4x1xf32>
      %c0_15 = arith.constant 0 : index
      %c0_16 = arith.constant 0 : index
      %31 = vector.load %arg7[%c0_15, %c0_16] : memref<4x8xf32, #tpu.memory_space<vmem>>, vector<4x8xf32>
      %32 = vector.broadcast %30 : vector<4x1xf32> to vector<4x8xf32>
      %33 = arith.divf %31, %32 : vector<4x8xf32>
      %cst_17 = arith.constant 0.000000e+00 : f32
      %34 = vector.shape_cast %26 : vector<4x1xi1> to vector<4x1xi1>
      %35 = vector.broadcast %34 : vector<4x1xi1> to vector<4x8xi1>
      %36 = vector.broadcast %cst_17 : f32 to vector<4x8xf32>
      %37 = arith.select %35, %33, %36 : vector<4x8xi1>, vector<4x8xf32>
      %38 = arith.mulf %4, %4 : vector<8x256xf32>
      %cst_18 = arith.constant dense<0.000000e+00> : vector<256xf32>
      %39 = vector.multi_reduction <add>, %38, %cst_18 [0] : vector<8x256xf32> to vector<256xf32>
      %40 = vector.shape_cast %39 : vector<256xf32> to vector<1x256xf32>
      %41 = arith.mulf %37, %37 : vector<4x8xf32>
      %cst_19 = arith.constant dense<0.000000e+00> : vector<4xf32>
      %42 = vector.multi_reduction <add>, %41, %cst_19 [1] : vector<4x8xf32> to vector<4xf32>
      %43 = vector.shape_cast %42 : vector<4xf32> to vector<4x1xf32>
      %cst_20 = arith.constant dense<0.000000e+00> : vector<4x256xf32>
      %44 = tpu.matmul %37, %4, %cst_20 {dimension_numbers = #tpu.dot_dimension_numbers<[1], [0], [0], [1], [0, 0, 1, 1], [], []>} : vector<4x8xf32>, vector<8x256xf32>, vector<4x256xf32> -> vector<4x256xf32>
      %45 = vector.broadcast %40 : vector<1x256xf32> to vector<4x256xf32>
      %46 = vector.broadcast %43 : vector<4x1xf32> to vector<4x256xf32>
      %47 = arith.addf %45, %46 : vector<4x256xf32>
      %cst_21 = arith.constant 2.000000e+00 : f32
      %48 = vector.broadcast %cst_21 : f32 to vector<4x256xf32>
      %49 = arith.mulf %48, %44 : vector<4x256xf32>
      %50 = arith.subf %47, %49 : vector<4x256xf32>
      %cst_22 = arith.constant 0.000000e+00 : f32
      %51 = vector.broadcast %cst_22 : f32 to vector<4x256xf32>
      %52 = arith.maximumf %50, %51 : vector<4x256xf32>
      %53 = math.sqrt %52 : vector<4x256xf32>
      %cst_23 = arith.constant 5.000000e-01 : f32
      %54 = vector.broadcast %cst_23 : f32 to vector<4x256xf32>
      %55 = arith.subf %53, %54 : vector<4x256xf32>
      %cst_24 = arith.constant 0.000000e+00 : f32
      %56 = vector.broadcast %cst_24 : f32 to vector<4x256xf32>
      %57 = arith.maximumf %55, %56 : vector<4x256xf32>
      %c0_25 = arith.constant 0 : index
      %c0_26 = arith.constant 0 : index
      %58 = vector.load %arg9[%c0_25, %c0_26] : memref<4x1xf32, #tpu.memory_space<vmem>>, vector<4x1xf32>
      %59 = arith.mulf %57, %57 : vector<4x256xf32>
      %60 = arith.mulf %59, %6 : vector<4x256xf32>
      %cst_27 = arith.constant dense<0.000000e+00> : vector<4xf32>
      %61 = vector.multi_reduction <add>, %60, %cst_27 [1] : vector<4x256xf32> to vector<4xf32>
      %62 = vector.shape_cast %61 : vector<4xf32> to vector<4x1xf32>
      %63 = arith.addf %58, %62 : vector<4x1xf32>
      %c0_28 = arith.constant 0 : index
      %c0_29 = arith.constant 0 : index
      %64 = vector.load %arg9[%c0_28, %c0_29] : memref<4x1xf32, #tpu.memory_space<vmem>>, vector<4x1xf32>
      tpu.vector_store %arg9[%c0_28, %c0_29], %63 {strides = array<i32>} : memref<4x1xf32, #tpu.memory_space<vmem>>, vector<4x1xf32>,
    } else {
    }
    %c1_i32_10 = arith.constant 1 : i32
    %18 = arith.cmpi eq, %arg1, %c1_i32_10 : i32
    %c3_i32 = arith.constant 3 : i32
    %19 = arith.cmpi eq, %arg2, %c3_i32 : i32
    %20 = arith.andi %18, %19 : i1
    %21 = arith.extui %20 : i1 to i32
    %c0_i32_11 = arith.constant 0 : i32
    %22 = arith.cmpi ne, %21, %c0_i32_11 : i32
    scf.if %22 {
      %c0_12 = arith.constant 0 : index
      %c0_13 = arith.constant 0 : index
      %23 = vector.load %arg8[%c0_12, %c0_13] : memref<4x1xf32, #tpu.memory_space<vmem>>, vector<4x1xf32>
      %24 = tpu.iota {dimensions = array<i32: 0>} : vector<4x1xi32>
      %25 = vector.broadcast %1 : i32 to vector<4x1xi32>
      %26 = arith.cmpi slt, %24, %25 : vector<4x1xi32>
      %27 = arith.extui %26 : vector<4x1xi1> to vector<4x1xi32>
      %28 = arith.sitofp %27 : vector<4x1xi32> to vector<4x1xf32>
      %cst = arith.constant 0.000000e+00 : f32
      %29 = vector.broadcast %cst : f32 to vector<4x1xf32>
      %30 = arith.cmpf ogt, %23, %29 : vector<4x1xf32>
      %cst_14 = arith.constant 1.000000e+00 : f32
      %31 = vector.broadcast %cst_14 : f32 to vector<4x1xf32>
      %32 = arith.select %30, %23, %31 : vector<4x1xi1>, vector<4x1xf32>
      %c0_15 = arith.constant 0 : index
      %c0_16 = arith.constant 0 : index
      %33 = vector.load %arg7[%c0_15, %c0_16] : memref<4x8xf32, #tpu.memory_space<vmem>>, vector<4x8xf32>
      %34 = vector.broadcast %32 : vector<4x1xf32> to vector<4x8xf32>
      %35 = arith.divf %33, %34 : vector<4x8xf32>
      %cst_17 = arith.constant 0.000000e+00 : f32
      %36 = vector.shape_cast %26 : vector<4x1xi1> to vector<4x1xi1>
      %37 = vector.broadcast %36 : vector<4x1xi1> to vector<4x8xi1>
      %38 = vector.broadcast %cst_17 : f32 to vector<4x8xf32>
      %39 = arith.select %37, %35, %38 : vector<4x8xi1>, vector<4x8xf32>
      %c0_18 = arith.constant 0 : index
      %c0_19 = arith.constant 0 : index
      %40 = vector.load %arg9[%c0_18, %c0_19] : memref<4x1xf32, #tpu.memory_space<vmem>>, vector<4x1xf32>
      %41 = arith.mulf %40, %28 : vector<4x1xf32>
      %42 = vector.shape_cast %41 : vector<4x1xf32> to vector<1x4x1xf32>
      %cst_20 = arith.constant dense<0.000000e+00> : vector<1xf32>
      %43 = vector.multi_reduction <add>, %42, %cst_20 [1, 2] : vector<1x4x1xf32> to vector<1xf32>
      %44 = vector.shape_cast %43 : vector<1xf32> to vector<1x1x1xf32>
      %45 = vector.extract %44[0, 0, 0] : f32 from vector<1x1x1xf32>
      %46 = arith.mulf %23, %28 : vector<4x1xf32>
      %47 = vector.shape_cast %46 : vector<4x1xf32> to vector<1x4x1xf32>
      %cst_21 = arith.constant dense<0.000000e+00> : vector<1xf32>
      %48 = vector.multi_reduction <add>, %47, %cst_21 [1, 2] : vector<1x4x1xf32> to vector<1xf32>
      %49 = vector.shape_cast %48 : vector<1xf32> to vector<1x1x1xf32>
      %50 = vector.extract %49[0, 0, 0] : f32 from vector<1x1x1xf32>
      %cst_22 = arith.constant 0.000000e+00 : f32
      %51 = arith.cmpf ogt, %50, %cst_22 : f32
      %52 = arith.divf %45, %50 : f32
      %cst_23 = arith.constant 0.000000e+00 : f32
      %53 = arith.select %51, %52, %cst_23 : f32
      %cst_24 = arith.constant dense<0.000000e+00> : vector<4x4xf32>
      %54 = tpu.matmul %39, %39, %cst_24 {dimension_numbers = #tpu.dot_dimension_numbers<[1], [1], [0], [0], [0, 0, 1, 0], [], []>} : vector<4x8xf32>, vector<4x8xf32>, vector<4x4xf32> -> vector<4x4xf32>
      %55 = tpu.iota {dimensions = array<i32: 0>} : vector<4x4xi32>
      %56 = tpu.iota {dimensions = array<i32: 1>} : vector<4x4xi32>
      %57 = arith.cmpi eq, %55, %56 : vector<4x4xi32>
      %cst_25 = arith.constant 0.000000e+00 : f32
      %58 = vector.broadcast %cst_25 : f32 to vector<4x4xf32>
      %59 = arith.select %57, %54, %58 : vector<4x4xi1>, vector<4x4xf32>
      %cst_26 = arith.constant dense<0.000000e+00> : vector<4xf32>
      %60 = vector.multi_reduction <add>, %59, %cst_26 [1] : vector<4x4xf32> to vector<4xf32>
      %61 = vector.shape_cast %60 : vector<4xf32> to vector<4x1xf32>
      %cst_27 = arith.constant dense<0.000000e+00> : vector<4xf32>
      %62 = vector.multi_reduction <add>, %59, %cst_27 [0] : vector<4x4xf32> to vector<4xf32>
      %63 = vector.shape_cast %62 : vector<4xf32> to vector<1x4xf32>
      %64 = vector.broadcast %61 : vector<4x1xf32> to vector<4x4xf32>
      %65 = vector.broadcast %63 : vector<1x4xf32> to vector<4x4xf32>
      %66 = arith.addf %64, %65 : vector<4x4xf32>
      %cst_28 = arith.constant 2.000000e+00 : f32
      %67 = vector.broadcast %cst_28 : f32 to vector<4x4xf32>
      %68 = arith.mulf %67, %54 : vector<4x4xf32>
      %69 = arith.subf %66, %68 : vector<4x4xf32>
      %cst_29 = arith.constant 0.000000e+00 : f32
      %70 = vector.broadcast %cst_29 : f32 to vector<4x4xf32>
      %71 = arith.maximumf %69, %70 : vector<4x4xf32>
      %72 = math.sqrt %71 : vector<4x4xf32>
      %73 = vector.broadcast %1 : i32 to vector<4x4xi32>
      %74 = arith.cmpi slt, %55, %73 : vector<4x4xi32>
      %75 = vector.broadcast %1 : i32 to vector<4x4xi32>
      %76 = arith.cmpi slt, %56, %75 : vector<4x4xi32>
      %77 = arith.andi %74, %76 : vector<4x4xi1>
      %78 = arith.cmpi ne, %55, %56 : vector<4x4xi32>
      %79 = arith.andi %77, %78 : vector<4x4xi1>
      %cst_30 = arith.constant 3.000000e+00 : f32
      %80 = vector.broadcast %cst_30 : f32 to vector<4x4xf32>
      %81 = arith.subf %80, %72 : vector<4x4xf32>
      %cst_31 = arith.constant 0.000000e+00 : f32
      %82 = vector.broadcast %cst_31 : f32 to vector<4x4xf32>
      %83 = arith.maximumf %81, %82 : vector<4x4xf32>
      %84 = arith.mulf %83, %83 : vector<4x4xf32>
      %cst_32 = arith.constant 0.000000e+00 : f32
      %85 = vector.broadcast %cst_32 : f32 to vector<4x4xf32>
      %86 = arith.select %79, %84, %85 : vector<4x4xi1>, vector<4x4xf32>
      %87 = vector.shape_cast %86 : vector<4x4xf32> to vector<1x4x4xf32>
      %cst_33 = arith.constant dense<0.000000e+00> : vector<1xf32>
      %88 = vector.multi_reduction <add>, %87, %cst_33 [1, 2] : vector<1x4x4xf32> to vector<1xf32>
      %89 = vector.shape_cast %88 : vector<1xf32> to vector<1x1x1xf32>
      %90 = vector.extract %89[0, 0, 0] : f32 from vector<1x1x1xf32>
      %c1_i32_34 = arith.constant 1 : i32
      %91 = arith.cmpi sgt, %1, %c1_i32_34 : i32
      %cst_35 = arith.constant 1.000000e+00 : f32
      %92 = arith.subf %2, %cst_35 : f32
      %93 = arith.mulf %2, %92 : f32
      %cst_36 = arith.constant 1.000000e+00 : f32
      %94 = arith.maximumf %93, %cst_36 : f32
      %95 = arith.divf %90, %94 : f32
      %cst_37 = arith.constant 0.000000e+00 : f32
      %96 = arith.select %91, %95, %cst_37 : f32
      %97 = math.sqrt %61 : vector<4x1xf32>
      %c0_i32_38 = arith.constant 0 : i32
      %98 = arith.cmpi sgt, %1, %c0_i32_38 : i32
      %99 = arith.mulf %97, %28 : vector<4x1xf32>
      %100 = vector.shape_cast %99 : vector<4x1xf32> to vector<1x4x1xf32>
      %cst_39 = arith.constant dense<0.000000e+00> : vector<1xf32>
      %101 = vector.multi_reduction <add>, %100, %cst_39 [1, 2] : vector<1x4x1xf32> to vector<1xf32>
      %102 = vector.shape_cast %101 : vector<1xf32> to vector<1x1x1xf32>
      %103 = vector.extract %102[0, 0, 0] : f32 from vector<1x1x1xf32>
      %cst_40 = arith.constant 1.000000e+00 : f32
      %104 = arith.maximumf %2, %cst_40 : f32
      %105 = arith.divf %103, %104 : f32
      %cst_41 = arith.constant 0.000000e+00 : f32
      %106 = arith.select %98, %105, %cst_41 : f32
      %107 = tpu.iota {dimensions = array<i32: 2>} : vector<1x8x128xi32>
      %c0_i32_42 = arith.constant 0 : i32
      %108 = vector.broadcast %c0_i32_42 : i32 to vector<1x8x128xi32>
      %109 = arith.cmpi eq, %107, %108 : vector<1x8x128xi32>
      %c1_i32_43 = arith.constant 1 : i32
      %110 = vector.broadcast %c1_i32_43 : i32 to vector<1x8x128xi32>
      %111 = arith.cmpi eq, %107, %110 : vector<1x8x128xi32>
      %c2_i32 = arith.constant 2 : i32
      %112 = vector.broadcast %c2_i32 : i32 to vector<1x8x128xi32>
      %113 = arith.cmpi eq, %107, %112 : vector<1x8x128xi32>
      %cst_44 = arith.constant 0.000000e+00 : f32
      %114 = vector.broadcast %106 : f32 to vector<1x8x128xf32>
      %115 = vector.broadcast %cst_44 : f32 to vector<1x8x128xf32>
      %116 = arith.select %113, %114, %115 : vector<1x8x128xi1>, vector<1x8x128xf32>
      %117 = vector.broadcast %96 : f32 to vector<1x8x128xf32>
      %118 = arith.select %111, %117, %116 : vector<1x8x128xi1>, vector<1x8x128xf32>
      %119 = vector.broadcast %53 : f32 to vector<1x8x128xf32>
      %120 = arith.select %109, %119, %118 : vector<1x8x128xi1>, vector<1x8x128xf32>
      %c0_45 = arith.constant 0 : index
      %c0_46 = arith.constant 0 : index
      %c0_47 = arith.constant 0 : index
      %121 = vector.load %arg6[%c0_45, %c0_46, %c0_47] : memref<1x8x128xf32, #tpu.memory_space<vmem>>, vector<1x8x128xf32>
      tpu.vector_store %arg6[%c0_45, %c0_46, %c0_47], %120 {strides = array<i32>} : memref<1x8x128xf32, #tpu.memory_space<vmem>>, vector<1x8x128xf32>,
    } else {
    }
    return
  }
  func.func @transform_0(%arg0: i32, %arg1: i32, %arg2: i32, %arg3: memref<2xi32, #tpu.memory_space<smem>>) -> (i32, i32, i32) {
    %c0_i32 = arith.constant 0 : i32
    %c0_i32_0 = arith.constant 0 : i32
    return %arg0, %c0_i32, %arg2 : i32, i32, i32
  }
  func.func @transform_1(%arg0: i32, %arg1: i32, %arg2: i32, %arg3: memref<2xi32, #tpu.memory_space<smem>>) -> (i32, i32, i32) {
    %c0_i32 = arith.constant 0 : i32
    %c0_i32_0 = arith.constant 0 : i32
    return %arg0, %c0_i32, %arg2 : i32, i32, i32
  }
  func.func @transform_2(%arg0: i32, %arg1: i32, %arg2: i32, %arg3: memref<2xi32, #tpu.memory_space<smem>>) -> (i32, i32, i32) {
    %c0_i32 = arith.constant 0 : i32
    %c0_i32_0 = arith.constant 0 : i32
    %c0_i32_1 = arith.constant 0 : i32
    return %arg0, %c0_i32, %c0_i32_0 : i32, i32, i32
  }
}

</mosaic_0001>

<bundles_post_ra>
// kernel: tpu_custom_call.1
= control target key start
LH: loop header
LB: loop body
LE: loop exit
PB: predicated region body
PF: predicated region fallthrough
CT: control target
= control target key end

     0   :  { %s1684_s0 = inlined_call_operand.hbm [shape: s32[2], index: 0, kind: input, shape index: {}]   ;;  %s1685_s1 = inlined_call_operand.hbm [shape: f32[2,8,1024], index: 1, kind: input, shape index: {}]   ;;  %s1686_s2 = inlined_call_operand.hbm [shape: f32[2,4,1024], index: 2, kind: input, shape index: {}]   ;;  %s1687_s3 = inlined_call_operand.hbm [shape: f32[2,8,128], index: 3, kind: output, shape index: {}]  }
   0x1   :  { %1694 = sst [smem:[#allocation22_spill]] %s1685_s1  ;;  %s1043_s14 = scalar_lea.hbm %s1684_s0, 16 }
   0x2   :  { %p1044_p0 = scmp.ne.s32.totalorder %s1684_s0, %s1043_s14  ;;  %p1047_p1 = scmp.lt.u32.totalorder %s1043_s14, %s1684_s0 }
   0x4   :  { %p1049_p2 = pnand %p1047_p1, %p1044_p0 }
   0x6   :  { %1052 = shalt.err (!%p1049_p2)  }
   0x7   :  { %s1259_s19 = smov [#allocation6]  }
   0x8   :  { %9 = dma.hbm_to_smem %s1684_s0, 16, %s1259_s19, [#allocation5] }
   0x9   :  { %1193 = dma.done.wait [#allocation5], 16 }
   0xa   :  { %1194 = vsyncadd [#allocation5], 4294967280 }
   0xb   :  { %11 = sfence }
   0xc   :  { %12 = vsyncpa [#allocation8], 0 }
   0xd   :  { %14 = vsyncpa [#allocation8 + $0x1], 0 }
   0xe   :  { %15 = vsyncpa [#allocation11], 0 }
   0xf   :  { %17 = vsyncpa [#allocation11 + $0x1], 0 }
  0x10   :  { %18 = vsyncpa [#allocation9], 0 }
  0x11   :  { %20 = vsyncpa [#allocation9 + $0x1], 0  ;;  %s1302_s22 = smov 0   ;;  %s1304_s23 = smov 0  }
  0x12   :  { %s1306_s24 = smov 0   ;;  %s1308_s25 = smov 0  }
  0x13   :  { %s1310_s26 = smov 0   ;;  %s1312_s0 = smov 0  }
  0x14   :  { %s1314_s27 = smov 0   ;;  %s1316_s28 = smov 0  }
  0x15   :  { %s1318_s29 = smov 0   ;;  %s1320_s30 = smov 0  }
  0x16   :  { %s1322_s4 = smov 0   ;;  %s1324_s5 = smov 0  }
  0x17   :  { %s1326_s6 = smov 0  }
  0x18 LB: > { %1695 = sst [smem:[#allocation17_spill]] %s1245_s30  ;;  %s842_s7 = sadd.s32 4294967295, %s1257_s6   ;;  %s1257_s6 = sphi %s1326_s6, %s26_s6   ;;  %s1253_s5 = sphi %s1324_s5, %s1729_s5   ;;  %s1249_s4 = sphi %s1322_s4, %s1720_s4   ;;  %s1245_s30 = sphi %s1320_s30, %s1719_s30   ;;  %s1241_s29 = sphi %s1318_s29, %s1728_s29   ;;  %s1237_s28 = sphi %s1316_s28, %s1718_s28   ;;  %s1233_s27 = sphi %s1314_s27, %s1717_s27   ;;  %s1229_s0 = sphi %s1312_s0, %s1727_s0   ;;  %s1225_s26 = sphi %s1310_s26, %s1726_s26   ;;  %s1221_s25 = sphi %s1308_s25, %s1725_s25   ;;  %s1217_s24 = sphi %s1306_s24, %s1724_s24   ;;  %s1213_s23 = sphi %s1304_s23, %s1723_s23   ;;  %s1209_s22 = sphi %s1302_s22, %s1722_s22  }
  0x19   : > { %1696 = sst [smem:[#allocation18_spill]] %s1249_s4  ;;  %s843_s8 = sadd.s32 4294967294, %s1257_s6  }
  0x1a   : > { %s38_s9 = sadd.s32 1, %s1245_s30  ;;  %s41_s10 = sadd.s32 1, %s1249_s4 }
  0x1b   : > { %p39_p3 = scmp.ge.s32.totalorder %s38_s9, 4  ;;  %s45_s11 = sadd.s32 1, %s1253_s5 }
  0x1c   : > { %s54_s12 = sadd.s32 1, %s1229_s0  ;;  %p61_p4 = scmp.ne.s32.totalorder %s1229_s0, %s1225_s26 }
  0x1d   : > { %s1731_s9 = smov (%p39_p3, %s38_s9), 0  ;;  %s1733_s10 = smov (!%p39_p3, %s41_s10), %s1249_s4 }
  0x1e   : > { %1697 = sst [smem:[#allocation19_spill]] %s1731_s9  ;;  %s50_s13 = ssub.s32 %s1245_s30, %s1731_s9 }
  0x1f   : > { %p62_p5 = scmp.eq.s32.totalorder %s1257_s6, 0  ;;  %p43_p6 = scmp.ge.s32.totalorder %s1733_s10, 2 }
  0x20   : > { %p67_p7 = scmp.ne.s32.totalorder %s1225_s26, %s1221_s25  ;;  %p68_p9 = scmp.eq.s32.totalorder %s842_s7, 0 }
  0x21   : > { %p1380_p8 = por %p62_p5, %p61_p4  ;;  %s1735_s10 = smov (%p43_p6, %s1733_s10), 0 }
  0x22   : > { %1699 = sst [smem:[#allocation20_spill]] %s1735_s10  ;;  %s1737_s11 = smov (!%p43_p6, %s45_s11), %s1253_s5 }
  0x23   : > { %p1387_p10 = por %p68_p9, %p67_p7  ;;  %s108_s16 = sadd.s32 1, %s1217_s24 }
  0x24   : > { %p47_p11 = scmp.ge.s32.totalorder %s1737_s11, 2  ;;  %p118_p12 = scmp.ne.s32.totalorder %s1217_s24, %s1213_s23 }
  0x25   : > { %s1700_s15 = scalar_select %p1387_p10, 1, 0 }
  0x26   : > { %p119_p13 = scmp.eq.s32.totalorder %s842_s7, 15  ;;  %p124_p0 = scmp.ne.s32.totalorder %s1213_s23, %s1209_s22 }
  0x27   : > { %s1739_s11 = smov (%p47_p11, %s1737_s11), 0  ;;  %p125_p2 = scmp.eq.s32.totalorder %s843_s8, 15 }
  0x28   : > { %1701 = sst [smem:[#allocation21_spill]] %s1739_s11  ;;  %p1398_p1 = por %p119_p13, %p118_p12 }
  0x29   : > { %s49_s18 = ssub.s32 %s1253_s5, %s1739_s11  ;;  %p1404_p5 = por %p125_p2, %p124_p0 }
  0x2a   : > { %s1702_s17 = scalar_select %p1398_p1, 1, 0 }
  0x2b   : > { %s51_s19 = sor.u32 %s50_s13, %s49_s18  ;;  %p106_p3 = scmp.eq.s32.totalorder %s49_s18, 0 }
  0x2c   : > { %p52_p4 = scmp.eq.s32.totalorder %s51_s19, 0  ;;  %p909_p6 = scmp.lt.s32.totalorder %s1257_s6, 16 }
  0x2d   : > { %s1703_s20 = scalar_select %p1404_p5, 1, 0 }
  0x2e   : > { %s1409_s21 = scalar_select %p106_p3, %s1217_s24, %s108_s16  }
  0x2f   : > { %s1412_s25 = scalar_select %p52_p4, %s1229_s0, %s54_s12  }
  0x30   : > { %s1416_s7 = sand.u32 1, %s1229_s0   ;;  %s847_s13 = sshll.u32 %s1245_s30, 1 }
  0x31   : > { %s846_s8 = sshll.u32 %s1416_s7, 4  ;;  %s848_s11 = sshll.u32 %s1253_s5, 3 }
  0x32   : > { %s149_s18 = scalar_lea.vmem [#allocation7], %s846_s8  ;;  %s1421_s10 = sadd.s32 %s848_s11, %s847_s13 }
  0x33   : > { %s159_s19 = sshll.u32 %s149_s18, 4  ;;  %s849_s9 = sshll.u32 %s1421_s10, 7  ;;  %s1423_s19 = int_to_ptr.vmem [resolvable:$true] %s159_s19 }
  0x34   : > { %p1428_p7 = pnand %p909_p6, %p1380_p8  ;;  %s1705_s1 = sld [smem:[#allocation22_spill]] }
  0x35   : > { %s146_s11 = scalar_lea.sflag [#allocation8], %s1416_s7 }
  0x36   : > { %p1055_p8 = pneg %p1428_p7 }
  0x3a   : > { %s1435_s30 = scalar_lea.hbm %s1705_s1, %s849_s9  ;;  %s1058_s9 = scalar_lea.hbm %s1705_s1, 2048 }
  0x3b   : > { %s1053_s8 = scalar_lea.hbm %s1435_s30, 256  ;;  %p1059_p2 = scmp.lt.u32.totalorder %s1435_s30, %s1705_s1 }
  0x3c   : > { %p1054_p12 = scmp.ne.s32.totalorder %s1435_s30, %s1053_s8  ;;  %p1060_p3 = scmp.lt.u32.totalorder %s1058_s9, %s1053_s8 }
  0x3d   : > { %p1062_p6 = scmp.lt.u32.totalorder %s1053_s8, %s1435_s30 }
  0x3e   : > { %p1056_p13 = pnand %p1055_p8, %p1054_p12  ;;  %p1061_p4 = por %p1060_p3, %p1059_p2 }
  0x40   : > { %p1057_p0 = pneg %p1056_p13  ;;  %p1063_p9 = por %p1062_p6, %p1061_p4 }
  0x42   : > { %p1064_p11 = pnand %p1063_p9, %p1057_p0 }
  0x44   : > { %1067 = shalt.err (!%p1064_p11)
}
  0x45   : > { %s1068_s16 = scalar_lea.vmem %s1423_s19, 256  ;;  %s1260_s4 = smov [#allocation7]  }
  0x46   : > { %p1069_p12 = scmp.ne.s32.totalorder %s1423_s19, %s1068_s16  ;;  %s1073_s14 = sshll.u32 %s1260_s4, 4  ;;  %s1074_s14 = int_to_ptr.vmem [resolvable:$false] %s1073_s14 }
  0x47   : > { %s1075_s13 = scalar_lea.vmem %s1074_s14, 512  ;;  %p1076_p1 = scmp.lt.s32.totalorder %s1423_s19, %s1074_s14 }
  0x48   : > { %p1071_p13 = pnand %p1069_p12, %p1055_p8  ;;  %p1077_p2 = scmp.lt.s32.totalorder %s1075_s13, %s1068_s16 }
  0x4a   : > { %p1072_p5 = pneg %p1071_p13  ;;  %p1078_p3 = por %p1077_p2, %p1076_p1 }
  0x4c   : > { %p1079_p4 = pnand %p1078_p3, %p1072_p5 }
  0x4e   : > { %1082 = shalt.err (!%p1079_p4)
}
  0x4f   : > { %901 = dma.hbm_to_vmem [thread:$0]  (!%p1428_p7), %s1435_s30, 256, %s1423_s19, %s146_s11  }
  0x50   : > { %p1706_p9 = scmp.lt.s32.totalorder %s1257_s6, 17  ;;  %p1707_p11 = scmp.ge.s32.totalorder %s1257_s6, 1 }
  0x51   : > { %s850_s9 = sshll.u32 %s1416_s7, 3  ;;  %s853_s18 = sshll.u32 %s1421_s10, 6 }
  0x52   : > { %p1469_p0 = pnand %p1707_p11, %p1706_p9  ;;  %s1478_s14 = scalar_lea.hbm %s1686_s2, %s853_s18 }
  0x53   : > { %s170_s13 = scalar_lea.vmem [#allocation10], %s850_s9  ;;  %s167_s30 = scalar_lea.sflag [#allocation11], %s1416_s7 }
  0x54   : > { %s1708_s8 = scalar_select %p1469_p0, 1, 0 }
  0x55   : > { %s180_s1 = sshll.u32 %s170_s13, 4  ;;  %s1083_s19 = scalar_lea.hbm %s1478_s14, 128  ;;  %s181_s1 = int_to_ptr.vmem [resolvable:$true] %s180_s1 }
  0x56   : > { %p1084_p1 = scmp.ne.s32.totalorder %s1478_s14, %s1083_s19  ;;  %s1088_s16 = scalar_lea.hbm %s1686_s2, 1024 }
  0x57   : > { %p1089_p12 = scmp.lt.u32.totalorder %s1478_s14, %s1686_s2  ;;  %p1090_p13 = scmp.lt.u32.totalorder %s1088_s16, %s1083_s19 }
  0x58   : > { %p1086_p5 = pnand %p1084_p1, %p1055_p8  ;;  %p1092_p3 = scmp.lt.u32.totalorder %s1083_s19, %s1478_s14 }
  0x59   : > { %p1091_p2 = por %p1090_p13, %p1089_p12 }
  0x5a   : > { %p1087_p6 = pneg %p1086_p5 }
  0x5b   : > { %p1093_p4 = por %p1092_p3, %p1091_p2 }
  0x5d   : > { %p1094_p9 = pnand %p1093_p4, %p1087_p6 }
  0x5f   : > { %1097 = shalt.err (!%p1094_p9)
}
  0x60   : > { %s1098_s7 = scalar_lea.vmem %s181_s1, 128  ;;  %s1261_s9 = smov [#allocation10]  }
  0x61   : > { %p1099_p11 = scmp.ne.s32.totalorder %s181_s1, %s1098_s7  ;;  %s1103_s13 = sshll.u32 %s1261_s9, 4  ;;  %s1104_s13 = int_to_ptr.vmem [resolvable:$false] %s1103_s13 }
  0x62   : > { %s1105_s10 = scalar_lea.vmem %s1104_s13, 256  ;;  %p1106_p10 = scmp.lt.s32.totalorder %s181_s1, %s1104_s13 }
  0x63   : > { %p1101_p1 = pnand %p1099_p11, %p1055_p8  ;;  %p1107_p0 = scmp.lt.s32.totalorder %s1105_s10, %s1098_s7 }
  0x65   : > { %p1102_p5 = pneg %p1101_p1  ;;  %p1108_p12 = por %p1107_p0, %p1106_p10 }
  0x67   : > { %p1109_p13 = pnand %p1108_p12, %p1102_p5 }
  0x69   : > { %1112 = shalt.err (!%p1109_p13)
}
  0x6a   : > { %904 = dma.hbm_to_vmem [thread:$0]  (!%p1428_p7), %s1478_s14, 128, %s181_s1, %s167_s30  }
  0x6b   : > { %p1709_p6 = scmp.ne.s32.totalorder %s1708_s8, 0 }
  0x6c   : > { %s191_s19 = sand.u32 (!%p1709_p6), 1, %s1225_s26   ;;  %p1710_p8 = scmp.ne.s32.totalorder (!%p1709_p6), %s1700_s15, 0 }
  0x6d   : > { %189 = sbr.rel (%p1709_p6) target bundleno = 1667 (0x683), region = 28  ;;  %s855_s11 = sshll.u32 (!%p1709_p6), %s191_s19, 4 }
  0x6e   : > { %s192_s16 = scalar_lea.sflag (!%p1709_p6), [#allocation8], %s191_s19  ;;  %s195_s18 = scalar_lea.vmem (!%p1709_p6), [#allocation7], %s855_s11 }
  0x74   : > { %1196 = dma.done.wait (%p1710_p8), %s192_s16, 256  }
  0x75   : > { %1198 = vsyncadd (%p1710_p8), %s192_s16, 4294967040  ;;  %s856_s4 = sshll.u32 %s191_s19, 3  ;;  %s201_s7 = scalar_lea.sflag [#allocation11], %s191_s19 }
  0x76   : > { %s204_s12 = scalar_lea.vmem [#allocation10], %s856_s4 }
  0x77   : > { %1200 = dma.done.wait (%p1710_p8), %s201_s7, 128  }
  0x78   : > { %1202 = vsyncadd (%p1710_p8), %s201_s7, 4294967168  ;;  %s227_s1 = sand.u32 1, %s1213_s23   ;;  %p237_p10 = scmp.eq.s32.totalorder %s1237_s28, 0  ;;  %v1524_v0 = vld [vmem:[%s195_s18] sm:$0xff]  ;;  %v1526_v1 = vld [vmem:[%s195_s18 + $0x8] sm:$0xff] }
  0x79   : > { %s1514_s8 = sld [smem:[#allocation6 + %s1241_s29]]  ;;  %s1518_s14 = sshll.u32 %s227_s1, 3  ;;  %v1528_v2 = vld [vmem:[%s204_s12] sm:$0xff] }
  0x7a   : > { %p238_p7 = scmp.eq.s32.totalorder %s1233_s27, 0  ;;  %s229_s15 = scalar_lea.vmem [#allocation12], %s1518_s14 }
  0x7c   : > { %p239_p0 = pnand %p238_p7, %p237_p10 }
  0x7d   : > { %vm243_vm0 = vcmask (!%p239_p0), 60416   ;;  %vm245_vm1 = vcmask (!%p239_p0), 3072   ;;  %v1262_v3 = vmov (!%p239_p0), 0.0  }
  0x7e   : > { %242 = sbr.rel (%p239_p0) target bundleno = 133 (0x85), region = 40  ;;  %244 = vst.msk [vmem:[#allocation2] sm:$0xf] (!%p239_p0), %vm243_vm0, %v1262_v3 }
  0x7f   : > { %s1522_s30 = scvt.s32.f32 %s1514_s8  ;;  %246 = vst.msk [vmem:[#allocation3] sm:$0xf] (!%p239_p0), %vm245_vm1, %v1262_v3  ;;  %247 = vst.msk [vmem:[#allocation4] sm:$0xf] (!%p239_p0), %vm245_vm1, %v1262_v3 }
  0x85 PF: > { %p858_p2 = scmp.ne.s32.totalorder %s1237_s28, 0 }
  0x86   : > { %255 = vmatprep.subr.mxu0 (!%p858_p2), %v1526_v1  ;;  %v253_v4 = vcombine.high (!%p858_p2), %v1528_v2, %v1528_v2  ;;  %vm329_vm2 = vcmask (!%p858_p2), 1043456   ;;  %v328_v8 = vld [vmem:[#allocation3] sm:$0xf] (!%p858_p2)  ;;  %vm336_vm3 = vcmask (!%p858_p2), 3072   ;;  %v251_v11 = vld [vmem:[#allocation2] sm:$0xf] (!%p858_p2) }
  0x87   : > { %250 = sbr.rel (%p858_p2) target bundleno = 353 (0x161), region = 44  ;;  %256 = vmatpush1.xpose.msra.mxu0 (!%p858_p2), %v1524_v0  ;;  %v330_v5 = vsel (!%p858_p2), %vm329_vm2, %v1528_v2, 0.0  ;;  %vm326_vm4 = vcmask (!%p858_p2), 60416  }
  0x88   : > { %319 = vmatprep.mubr.f32.mxu0 (!%p858_p2), %v253_v4  ;;  %v331_v6 = vsel (!%p858_p2), %vm329_vm2, %v253_v4, 0.0 }
  0x89   : > { %v332_v7 = vadd.f32 (!%p858_p2), %v331_v6, %v330_v5 }
  0x8a   : > { %320 = vmatmul.mubr.f32.vlgmr.msra.gmra.mrb[0].mxu0 (!%p858_p2), %v1528_v2 }
  0x8b   : > { %333 = vadd.xlane.f32.xlu0 (!%p858_p2), %v332_v7 }
 0x118   : > { %v334_v9 = vpop.xlane.xlu0 %333 }
 0x119   : > { %v335_v10 = vadd.f32 %v334_v9, %v328_v8 }
 0x11b   : > { %337 = vst.msk [vmem:[#allocation3] sm:$0xf] %vm336_vm3, %v335_v10 }
 0x15d   : > { %v321_v12 = vpop.f32.mrb[0].mxu0 }
 0x15e   : > { %v325_v13 = vadd.f32 %v321_v12, %v251_v11  ;;  %v323_v14 = vpop.f32.mrb[1].mxu0 }
 0x160   : > { %327 = vst.msk [vmem:[#allocation2] sm:$0xf] %vm326_vm4, %v325_v13 }
 0x161 PF: > { %p338_p3 = scmp.eq.s32.totalorder %s1237_s28, 1  ;;  %p859_p4 = scmp.ne.s32.totalorder %s1237_s28, 1 }
 0x162   : > { %v342_v15 = vld [vmem:[#allocation3] sm:$0xf] (!%p859_p4)  ;;  %383 = vmatprep.subr.mxu0 (!%p859_p4), %v1526_v1  ;;  %v1263_v16 = vmov (!%p859_p4), 0   ;;  %v1264_v18 = vmov (!%p859_p4), 0.0   ;;  %v343_v20 = vlaneseq (!%p859_p4)  ;;  %v345_v22 = vstv (!%p859_p4), %s1514_s8  ;;  %v480_v13 = vld [vmem:[#allocation4] sm:$0xf] (!%p859_p4) }
 0x163   : > { %341 = sbr.rel (%p859_p4) target bundleno = 889 (0x379), region = 48  ;;  %1023 = vset.pattern.permute.xlu0 (!%p859_p4), %v1263_v16  ;;  %vm347_vm5 = vcmp.gt.f32.partialorder (!%p859_p4), %v342_v15, 0.0  ;;  %384 = vmatpush1.msra.mxu0 (!%p859_p4), %v1524_v0  ;;  %vm379_vm7 = vcmask (!%p859_p4), 64512   ;;  %vm375_vm8 = vcmask (!%p859_p4), 60416   ;;  %v360_v29 = vmul.f32 (!%p859_p4), %v1524_v0, %v1524_v0 }
 0x164   : > { %v348_v17 = vsel (!%p859_p4), %vm347_vm5, %v342_v15, 1.0  ;;  %447 = vmatprep.mubr.f32.mxu0 (!%p859_p4), %v1264_v18  ;;  %v344_v21 = vshrl.u32 (!%p859_p4), %v343_v20, 7  ;;  %v361_v30 = vmul.f32 (!%p859_p4), %v1526_v1, %v1526_v1  ;;  %v484_v5 = vcombine.high (!%p859_p4), %v1528_v2, %v1528_v2 }
 0x165   : > { %352 = vperm.xlu0 (!%p859_p4), %1023, %v348_v17   ;;  %v362_v31 = vrot.slane (!%p859_p4), %v360_v29, 4  ;;  %vm488_vm13 = vcmask (!%p859_p4), 1043456   ;;  %vm495_vm14 = vcmask (!%p859_p4), 3072  }
 0x166   : > { %vm346_vm6 = vcmp.lt.s32.totalorder (!%p859_p4), %v344_v21, %v345_v22  ;;  %v368_v32 = vrot.slane (!%p859_p4), %v361_v30, 4 }
 0x167   : > { %v349_v23 = vld [vmem:[#allocation2] sm:$0xf] (!%p859_p4)  ;;  %v363_v33 = vadd.f32 (!%p859_p4), %v362_v31, %v360_v29 }
 0x168   : > { %v369_v34 = vadd.f32 (!%p859_p4), %v368_v32, %v361_v30 }
 0x169   : > { %v364_v35 = vrot.slane (!%p859_p4), %v363_v33, 2 }
 0x16a   : > { %v370_v36 = vrot.slane %v369_v34, 2 }
 0x16b   : > { %v365_v37 = vadd.f32 %v364_v35, %v363_v33 }
 0x16c   : > { %v371_v38 = vadd.f32 %v370_v36, %v369_v34 }
 0x16d   : > { %v366_v39 = vrot.slane %v365_v37, 1 }
 0x16e   : > { %v372_v40 = vrot.slane %v371_v38, 1 }
 0x16f   : > { %v367_v41 = vadd.f32 %v366_v39, %v365_v37 }
 0x170   : > { %v373_v42 = vadd.f32 %v372_v40, %v371_v38 }
 0x1e4   : > { %v353_v19 = vpop.permute.xlu0 %352 }
 0x1e5   : > { %1024 = vrcp.f32 %v353_v19 }
 0x1ef   : > { %v1025_v24 = vpop.eup %1024 }
 0x1f0   : > { %v356_v25 = vmul.f32 %v1025_v24, %v349_v23 }
 0x1f2   : > { %v359_v26 = vsel %vm346_vm6, %v356_v25, 0.0 }
 0x1f3   : > { %860 = vmatmul.mubr.msk.f32.vlgmr.msra.gmra.mrb[0].mxu0 %vm379_vm7, %v359_v26  ;;  %v374_v27 = vmul.f32 %v359_v26, %v359_v26 }
 0x1f5   : > { %v376_v28 = vsel %vm375_vm8, %v374_v27, 0.0 }
 0x1f6   : > { %377 = vadd.xlane.f32.xlu0 %v376_v28 }
 0x283   : > { %v378_v43 = vpop.xlane.xlu0 %377 }
 0x284   : > { %v454_v45 = vadd.f32 %v378_v43, %v367_v41  ;;  %v455_v48 = vadd.f32 %v378_v43, %v373_v42 }
 0x2c6   : > { %v449_v44 = vpop.f32.mrb[0].mxu0 }
 0x2c7   : > { %v456_v46 = vmul.f32 2.0, %v449_v44  ;;  %v451_v47 = vpop.f32.mrb[1].mxu0 }
 0x2c8   : > { %v457_v49 = vmul.f32 2.0, %v451_v47 }
 0x2c9   : > { %v458_v50 = vsub.f32 %v454_v45, %v456_v46 }
 0x2ca   : > { %v459_v51 = vsub.f32 %v455_v48, %v457_v49 }
 0x2cb   : > { %v460_v52 = vmax.f32 %v458_v50, 0.0 }
 0x2cc   : > { %v461_v53 = vmax.f32 %v459_v51, 0.0 }
 0x2cd   : > { %1026 = vrsqrt.f32 %v460_v52  ;;  %vm464_vm9 = vcmp.eq.f32.partialorder %v460_v52, inf  ;;  %v467_v57 = vand.u32 2147483648, %v460_v52  ;;  %vm466_vm10 = vcmp.eq.f32.partialorder %v460_v52, 0.0 }
 0x2ce   : > { %1028 = vrsqrt.f32 %v461_v53  ;;  %vm471_vm11 = vcmp.eq.f32.partialorder %v461_v53, inf  ;;  %v474_v60 = vand.u32 2147483648, %v461_v53  ;;  %vm473_vm12 = vcmp.eq.f32.partialorder %v461_v53, 0.0 }
 0x2d7   : > { %v1027_v54 = vpop.eup %1026 }
 0x2d8   : > { %v1029_v55 = vpop.eup %1028  ;;  %v463_v56 = vmul.f32 %v1027_v54, %v460_v52 }
 0x2d9   : > { %v470_v58 = vmul.f32 %v1029_v55, %v461_v53 }
 0x2da   : > { %v465_v59 = vsel %vm464_vm9, %v460_v52, %v463_v56 }
 0x2db   : > { %v468_v61 = vsel %vm466_vm10, %v467_v57, %v465_v59  ;;  %v472_v62 = vsel %vm471_vm11, %v461_v53, %v470_v58 }
 0x2dc   : > { %v475_v63 = vsel %vm473_vm12, %v474_v60, %v472_v62  ;;  %v861_v0 = vadd.f32 -0.5, %v468_v61 }
 0x2dd   : > { %v862_v1 = vadd.f32 -0.5, %v475_v63 }
 0x2de   : > { %v478_v3 = vmax.f32 %v861_v0, 0.0 }
 0x2df   : > { %v479_v4 = vmax.f32 %v862_v1, 0.0 }
 0x2e0   : > { %v481_v6 = vmul.f32 %v478_v3, %v478_v3 }
 0x2e1   : > { %v482_v7 = vmul.f32 %v479_v4, %v479_v4 }
 0x2e2   : > { %v486_v8 = vmul.f32 %v481_v6, %v1528_v2 }
 0x2e3   : > { %v487_v9 = vmul.f32 %v484_v5, %v482_v7 }
 0x2e4   : > { %v489_v10 = vsel %vm488_vm13, %v486_v8, 0.0 }
 0x2e5   : > { %v490_v11 = vsel %vm488_vm13, %v487_v9, 0.0 }
 0x2e6   : > { %v491_v12 = vadd.f32 %v490_v11, %v489_v10 }
 0x2e8   : > { %492 = vadd.xlane.f32.xlu1 %v491_v12 }
 0x375   : > { %v493_v14 = vpop.xlane.xlu1 %492 }
 0x376   : > { %v494_v15 = vadd.f32 %v493_v14, %v480_v13 }
 0x378   : > { %496 = vst.msk [vmem:[#allocation4] sm:$0xf] %vm495_vm14, %v494_v15 }
 0x379 PF: > { %p497_p9 = scmp.eq.s32.totalorder %s1233_s27, 3 }
 0x37b   : > { %p498_p11 = pnand %p497_p9, %p338_p3 }
 0x37c   : > { %v502_v16 = vld [vmem:[#allocation3] sm:$0xf] (!%p498_p11)  ;;  %v1265_v2 = vmov (!%p498_p11), 0   ;;  %v1266_v18 = vmov (!%p498_p11), 0.0   ;;  %vm1267_vm0 = vmmov (!%p498_p11), 0   ;;  %v503_v20 = vlaneseq (!%p498_p11)  ;;  %s866_s10 = sadd.f32 (!%p498_p11), -1.0, %s1522_s30 }
 0x37d   : > { %501 = sbr.rel (%p498_p11) target bundleno = 1642 (0x66a), region = 52  ;;  %1030 = vset.pattern.permute.xlu0 (!%p498_p11), %v1265_v2  ;;  %vm509_vm15 = vcmp.gt.f32.partialorder (!%p498_p11), %v502_v16, 0.0  ;;  %873 = vmatprep.subr.mxu0 (!%p498_p11), %v1266_v18  ;;  %v505_v22 = vstv (!%p498_p11), %s1514_s8  ;;  %v511_v23 = vld [vmem:[#allocation2] sm:$0xf] (!%p498_p11)  ;;  %vm551_vm2 = vcmask (!%p498_p11), 64512   ;;  %vm523_vm3 = vcmask (!%p498_p11), 3072  }
 0x37e   : > { %v510_v17 = vsel (!%p498_p11), %vm509_vm15, %v502_v16, 1.0  ;;  %875 = vmatprep.mubr.msk.f32.mxu0 (!%p498_p11), %vm1267_vm0, %v1266_v18  ;;  %v1553_v21 = vshrl.u32 (!%p498_p11), %v503_v20, 7  ;;  %v1573_v34 = vand.u32 (!%p498_p11), 127, %v503_v20  ;;  %vm629_vm5 = vcmask (!%p498_p11), 27648   ;;  %s670_s19 = smul.f32 (!%p498_p11), %s866_s10, %s1522_s30  ;;  %s1268_s11 = smov (!%p498_p11), 1.0  }
 0x37f   : > { %514 = vperm.xlu0 (!%p498_p11), %1030, %v510_v17   ;;  %v521_v29 = vld [vmem:[#allocation4] sm:$0xf] (!%p498_p11)  ;;  %s696_s18 = smax.f32 (!%p498_p11), %s1268_s11, %s1522_s30  ;;  %p668_p5 = scmp.gt.s32.totalorder (!%p498_p11), %s1514_s8, 1 }
 0x380   : > { %vm1559_vm1 = vcmp.lt.s32.totalorder (!%p498_p11), %v1553_v21, %v505_v22  ;;  %vm627_vm4 = vcmp.eq.s32.totalorder (!%p498_p11), %v1553_v21, %v1573_v34  ;;  %vm650_vm7 = vcmp.lt.s32.totalorder (!%p498_p11), %v1573_v34, %v505_v22  ;;  %vm652_vm10 = vcmp.ne.s32.totalorder (!%p498_p11), %v1553_v21, %v1573_v34  ;;  %s671_s16 = smax.f32 (!%p498_p11), %s1268_s11, %s670_s19  ;;  %p684_p12 = scmp.gt.s32.totalorder (!%p498_p11), %s1514_s8, 0 }
 0x381   : > { %v1567_v28 = vsel (!%p498_p11), %vm1559_vm1, 1.0, %v1266_v18  ;;  %vm651_vm9 = vmand (!%p498_p11), %vm1559_vm1, %vm650_vm7  ;;  %v697_v22 = vstv (!%p498_p11), %s696_s18  ;;  %vm704_vm14 = vcmp.eq.s32.totalorder (!%p498_p11), %v1573_v34, 2  ;;  %vm703_vm15 = vcmp.eq.s32.totalorder (!%p498_p11), %v1573_v34, 1 }
 0x382   : > { %v522_v30 = vmul.f32 (!%p498_p11), %v1567_v28, %v521_v29  ;;  %v534_v31 = vmul.f32 (!%p498_p11), %v1567_v28, %v502_v16  ;;  %vm653_vm12 = vmand (!%p498_p11), %vm651_vm9, %vm652_vm10  ;;  %vm702_vm0 = vcmp.eq.s32.totalorder (!%p498_p11), %v1573_v34, 0 }
 0x384   : > { %v524_v32 = vsel %vm523_vm3, %v522_v30, 0.0  ;;  %v535_v33 = vsel %vm523_vm3, %v534_v31, 0.0 }
 0x385   : > { %525 = vadd.xlane.f32.xlu1 %v524_v32 }
 0x389   : > { %536 = vadd.xlane.f32.xlu1 %v535_v33 }
 0x3fe   : > { %v515_v19 = vpop.permute.xlu0 %514 }
 0x3ff   : > { %1031 = vrcp.f32 %v515_v19  ;;  %v672_v19 = vstv %s671_s16 }
 0x409   : > { %v1032_v24 = vpop.eup %1031 }
 0x40a   : > { %v518_v26 = vmul.f32 %v1032_v24, %v511_v23 }
 0x40c   : > { %v520_v27 = vsel %vm1559_vm1, %v518_v26, 0.0 }
 0x40d   : > { %874 = vmatpush3.xpose.msk.msra.mxu0 %vm551_vm2, %v520_v27 }
 0x410   : > { %876 = vmatmul.mubr.msk.f32.vlgmr.msra.gmra.mrb[0].mxu0 %vm551_vm2, %v520_v27 }
 0x412   : > { %v526_v39 = vpop.xlane.xlu1 %525 }
 0x413   : > { %v527_v40 = vrot.slane %v526_v39, 4 }
 0x415   : > { %v528_v41 = vadd.f32 %v527_v40, %v526_v39 }
 0x416   : > { %v537_v42 = vpop.xlane.xlu1 %536 }
 0x417   : > { %v529_v43 = vrot.slane %v528_v41, 2  ;;  %v538_v44 = vrot.slane %v537_v42, 4 }
 0x419   : > { %v539_v45 = vadd.f32 %v538_v44, %v537_v42  ;;  %v530_v46 = vadd.f32 %v529_v43, %v528_v41 }
 0x41b   : > { %v540_v47 = vrot.slane %v539_v45, 2  ;;  %v531_v48 = vrot.slane %v530_v46, 1 }
 0x41d   : > { %v532_v49 = vadd.f32 %v531_v48, %v530_v46  ;;  %v541_v50 = vadd.f32 %v540_v47, %v539_v45 }
 0x41f   : > { %878 = vpush %v532_v49  ;;  %v542_v51 = vrot.slane %v541_v50, 1 }
 0x421   : > { %v543_v52 = vadd.f32 %v542_v51, %v541_v50 }
 0x423   : > { %880 = vpush %v543_v52 }
 0x450   : > { %s1578_s27 = spop %878 }
 0x454   : > { %s1580_s28 = spop %880 }
 0x455   : > { %v546_v53 = vstv %s1580_s28  ;;  %p545_p1 = scmp.gt.f32.partialorder %s1580_s28, 0.0 }
 0x456   : > { %1033 = vrcp.f32 %v546_v53 }
 0x460   : > { %v1034_v56 = vpop.eup %1033 }
 0x461   : > { %882 = vpush %v1034_v56 }
 0x492   : > { %s883_s9 = spop %882 }
 0x493   : > { %s549_s13 = smul.f32 %s883_s9, %s1578_s27 }
 0x495   : > { %s1741_s13 = smov (!%p545_p1, %s549_s13), 0.0 }
 0x496   : > { %v709_v41 = vstv %s1741_s13 }
 0x4e3   : > { %v621_v35 = vpop.f32.mrb[0].mxu0 }
 0x4e4   : > { %v628_v36 = vsel %vm627_vm4, %v621_v35, 0.0  ;;  %v877_v37 = vpop.f32.mrb[1].mxu0  ;;  %v640_v62 = vmul.f32 2.0, %v621_v35 }
 0x4e5   : > { %v630_v38 = vsel %vm629_vm5, %v628_v36, 0.0 }
 0x4e6   : > { %631 = vadd.xlane.f32.xlu0 %v630_v38  ;;  %v633_v54 = vrot.slane %v630_v38, 4 }
 0x4e8   : > { %v634_v55 = vadd.f32 %v633_v54, %v630_v38 }
 0x4ea   : > { %v635_v57 = vrot.slane %v634_v55, 2 }
 0x4ec   : > { %v636_v58 = vadd.f32 %v635_v57, %v634_v55 }
 0x4ee   : > { %v637_v59 = vrot.slane %v636_v58, 1 }
 0x4f0   : > { %v638_v60 = vadd.f32 %v637_v59, %v636_v58 }
 0x573   : > { %v632_v61 = vpop.xlane.xlu0 %631 }
 0x574   : > { %v639_v63 = vadd.f32 %v638_v60, %v632_v61  ;;  %1035 = vrsqrt.f32 %v632_v61  ;;  %vm679_vm11 = vcmp.eq.f32.partialorder %v632_v61, inf  ;;  %v682_v13 = vand.u32 2147483648, %v632_v61 }
 0x575   : > { %vm681_vm13 = vcmp.eq.f32.partialorder %v632_v61, 0.0 }
 0x576   : > { %v641_v0 = vsub.f32 %v639_v63, %v640_v62 }
 0x578   : > { %v642_v1 = vmax.f32 %v641_v0, 0.0 }
 0x57a   : > { %1037 = vrsqrt.f32 %v642_v1  ;;  %vm645_vm6 = vcmp.eq.f32.partialorder %v642_v1, inf  ;;  %v648_v6 = vand.u32 2147483648, %v642_v1  ;;  %vm647_vm8 = vcmp.eq.f32.partialorder %v642_v1, 0.0 }
 0x57b   : > { %1039 = vrcp.f32 %v672_v19 }
 0x57c   : > { %1041 = vrcp.f32 %v697_v22 }
 0x57e   : > { %v1036_v3 = vpop.eup %1035 }
 0x57f   : > { %v678_v7 = vmul.f32 %v1036_v3, %v632_v61 }
 0x581   : > { %v680_v11 = vsel %vm679_vm11, %v632_v61, %v678_v7 }
 0x582   : > { %v683_v15 = vsel %vm681_vm13, %v682_v13, %v680_v11 }
 0x583   : > { %v685_v17 = vmul.f32 %v1567_v28, %v683_v15 }
 0x584   : > { %v1038_v4 = vpop.eup %1037 }
 0x585   : > { %v644_v5 = vmul.f32 %v1038_v4, %v642_v1  ;;  %v686_v18 = vsel %vm523_vm3, %v685_v17, 0.0  ;;  %v1040_v31 = vpop.eup %1039 }
 0x586   : > { %v1042_v36 = vpop.eup %1041 }
 0x587   : > { %v646_v8 = vsel %vm645_vm6, %v642_v1, %v644_v5 }
 0x588   : > { %v649_v9 = vsel %vm647_vm8, %v648_v6, %v646_v8 }
 0x589   : > { %v654_v10 = vsub.f32 3.0, %v649_v9 }
 0x58b   : > { %v655_v12 = vmax.f32 %v654_v10, 0.0 }
 0x58d   : > { %v656_v14 = vmul.f32 %v655_v12, %v655_v12 }
 0x58f   : > { %v657_v16 = vsel %vm653_vm12, %v656_v14, 0.0 }
 0x590   : > { %v658_v2 = vsel %vm629_vm5, %v657_v16, 0.0 }
 0x591   : > { %659 = vadd.xlane.f32.xlu1 %v658_v2 }
 0x595   : > { %687 = vadd.xlane.f32.xlu1 %v686_v18 }
 0x61e   : > { %v660_v20 = vpop.xlane.xlu1 %659 }
 0x61f   : > { %v661_v21 = vrot.slane %v660_v20, 4 }
 0x621   : > { %v662_v23 = vadd.f32 %v661_v21, %v660_v20 }
 0x622   : > { %v688_v24 = vpop.xlane.xlu1 %687 }
 0x623   : > { %v663_v25 = vrot.slane %v662_v23, 2  ;;  %v689_v26 = vrot.slane %v688_v24, 4 }
 0x625   : > { %v690_v27 = vadd.f32 %v689_v26, %v688_v24  ;;  %v664_v28 = vadd.f32 %v663_v25, %v662_v23 }
 0x627   : > { %v691_v29 = vrot.slane %v690_v27, 2  ;;  %v665_v30 = vrot.slane %v664_v28, 1 }
 0x629   : > { %v692_v32 = vadd.f32 %v691_v29, %v690_v27  ;;  %v666_v33 = vadd.f32 %v665_v30, %v664_v28 }
 0x62b   : > { %884 = vpush %v666_v33  ;;  %v693_v35 = vrot.slane %v692_v32, 1 }
 0x62c   : > { %886 = vpush %v1040_v31 }
 0x62d   : > { %v694_v37 = vadd.f32 %v693_v35, %v692_v32 }
 0x62f   : > { %888 = vpush %v694_v37 }
 0x630   : > { %890 = vpush %v1042_v36 }
 0x65c   : > { %s885_s4 = spop %884 }
 0x65d   : > { %s887_s7 = spop %886 }
 0x65e   : > { %s675_s12 = smul.f32 %s887_s7, %s885_s4 }
 0x660   : > { %s889_s30 = spop %888  ;;  %s1743_s12 = smov (!%p668_p5, %s675_s12), 0.0 }
 0x661   : > { %s891_s27 = spop %890  ;;  %v707_v39 = vstv %s1743_s12 }
 0x662   : > { %s700_s28 = smul.f32 %s891_s27, %s889_s30 }
 0x664   : > { %s1745_s28 = smov (!%p684_p12, %s700_s28), 0.0 }
 0x665   : > { %v705_v38 = vstv %s1745_s28 }
 0x666   : > { %v706_v40 = vsel %vm704_vm14, %v705_v38, 0.0 }
 0x667   : > { %v708_v42 = vsel %vm703_vm15, %v707_v39, %v706_v40 }
 0x668   : > { %v710_v43 = vsel %vm702_vm0, %v709_v41, %v708_v42 }
 0x669   : > { %711 = vst [vmem:[%s229_s15] sm:$0xff] %v710_v43 }
 0x66a PF: > { %s868_s8 = sshll.u32 %s1241_s29, 7  ;;  %s726_s11 = sshll.u32 %s229_s15, 4  ;;  %s727_s11 = int_to_ptr.vmem [resolvable:$true] %s726_s11 }
 0x66b   : > { %s1612_s19 = scalar_lea.hbm %s1687_s3, %s868_s8  ;;  %s713_s13 = scalar_lea.sflag [#allocation9], %s227_s1 }
 0x66c   : > { %s1113_s16 = scalar_lea.vmem %s727_s11, 128  ;;  %p1713_p6 = scmp.ne.s32.totalorder %s1702_s17, 0 }
 0x66d   : > { %p1114_p13 = scmp.ne.s32.totalorder %s727_s11, %s1113_s16  ;;  %s1269_s18 = smov [#allocation12]  }
 0x66e   : > { %s1117_s4 = sshll.u32 %s1269_s18, 4  ;;  %s1118_s4 = int_to_ptr.vmem [resolvable:$false] %s1117_s4 }
 0x66f   : > { %p1115_p8 = pnand %p1114_p13, %p1713_p6  ;;  %s1119_s7 = scalar_lea.vmem %s1118_s4, 256 }
 0x670   : > { %p1120_p7 = scmp.lt.s32.totalorder %s727_s11, %s1118_s4  ;;  %p1121_p0 = scmp.lt.s32.totalorder %s1119_s7, %s1113_s16 }
 0x671   : > { %p1116_p10 = pneg %p1115_p8 }
 0x672   : > { %p1122_p2 = por %p1121_p0, %p1120_p7 }
 0x674   : > { %p1123_p3 = pnand %p1122_p2, %p1116_p10 }
 0x676   : > { %1126 = shalt.err (!%p1123_p3)
}
 0x677   : > { %s1127_s29 = scalar_lea.hbm %s1612_s19, 128  ;;  %s1131_s15 = scalar_lea.hbm %s1687_s3, 256 }
 0x678   : > { %p1128_p4 = scmp.ne.s32.totalorder %s1612_s19, %s1127_s29  ;;  %p1132_p1 = scmp.lt.u32.totalorder %s1612_s19, %s1687_s3 }
 0x679   : > { %p1133_p5 = scmp.lt.u32.totalorder %s1131_s15, %s1127_s29  ;;  %p1135_p13 = scmp.lt.u32.totalorder %s1127_s29, %s1612_s19 }
 0x67a   : > { %p1129_p9 = pnand %p1128_p4, %p1713_p6 }
 0x67b   : > { %p1134_p12 = por %p1133_p5, %p1132_p1 }
 0x67c   : > { %p1130_p11 = pneg %p1129_p9 }
 0x67d   : > { %p1136_p8 = por %p1135_p13, %p1134_p12 }
 0x67f   : > { %p1137_p10 = pnand %p1136_p8, %p1130_p11 }
 0x681   : > { %1140 = shalt.err (!%p1137_p10)
}
 0x682   : > { %896 = dma.vmem_to_hbm [thread:$0]  (%p1713_p6), %s727_s11, 128, %s1612_s19, %s713_s13  }
 0x683 PF: > { %p910_p7 = scmp.ge.s32.totalorder %s1257_s6, 2  ;;  %s738_s27 = sand.u32 1, %s1209_s22  }
 0x684   : > { %p1714_p0 = scmp.ne.s32.totalorder %s1703_s20, 0  ;;  %s739_s28 = scalar_lea.sflag [#allocation9], %s738_s27 }
 0x686   : > { %p906_p2 = pnand %p910_p7, %p1714_p0 }
 0x688   : > { %1204 = dma.done.wait (!%p906_p2), %s739_s28, 128  }
 0x689   : > { %1206 = vsyncadd (!%p906_p2), %s739_s28, 4294967168  ;;  %s26_s6 = sadd.s32 1, %s1257_s6   ;;  %s1716_s17 = smov %s1412_s25 }
 0x68a   : > { %p1640_p3 = scmp.ge.s32.totalorder %s26_s6, 18   ;;  %s1717_s27 = sld [smem:[#allocation17_spill]] }
 0x68b   : > { %s1718_s28 = sld [smem:[#allocation18_spill]]  ;;  %s1719_s30 = sld [smem:[#allocation19_spill]] }
 0x68c   : > { %s1720_s4 = sld [smem:[#allocation20_spill]]  ;;  %s1721_s20 = sld [smem:[#allocation21_spill]] }
 0x68d   : > { %s1722_s22 = smov %s1213_s23  ;;  %s1723_s23 = smov %s1217_s24 }
 0x68e   : > { %s1724_s24 = smov %s1409_s21  ;;  %s1725_s25 = smov %s1225_s26 }
 0x68f   : > { %s1726_s26 = smov %s1229_s0  ;;  %s1727_s0 = smov %s1716_s17 }
 0x690   : > { %s1728_s29 = smov %s1253_s5  ;;  %25 = sbr.rel (!%p1640_p3) target bundleno = 24 (0x18), region = 102 }
 0x692   : > { %s1729_s5 = smov %s1721_s20 }
 0x697   :  { %744 = vsyncpa [#allocation8], 1 }
 0x698   :  { %746 = vsyncpa [#allocation8 + $0x1], 1 }
 0x699   :  { %747 = vsyncpa [#allocation11], 1 }
 0x69a   :  { %749 = vsyncpa [#allocation11 + $0x1], 1 }
 0x69b   :  { %750 = vsyncpa [#allocation9], 1 }
 0x69c   :  { %752 = vsyncpa [#allocation9 + $0x1], 1 }

</bundles_post_ra>
